<compile_context>
chip_gen: v7x
topology: tpu7x:2x2x1
jax: 0.10.0
libtpu: 0.0.40
codegen_flags: <defaults>
</compile_context>

<pallas_src>
import functools

import jax
import jax.numpy as jnp
from jax.experimental import pallas as pl
from jax.experimental.pallas import tpu as pltpu

EPS = 1e-5
_LANE = 128      # TPU vreg lane width
_SUBLANE = 8     # f32 sublane granularity
# Conservative per-pass working-set budget (tile x 2 input bufs + 2 output
# bufs).  Fits default scoped VMEM everywhere, no vmem_limit override needed.
_VMEM_WORKSET_BUDGET = 8 * 1024 * 1024
_MAX_ROWS_TILE = 1024


def _stats_kernel(x_ref, sum_ref, sq_ref, *, rows_tile, valid_rows, ragged):
    """Pass 1: accumulate per-lane sum and sum-of-squares over row tiles.

    sum_ref / sq_ref are (1, C_lane) f32 outputs whose BlockSpec returns the
    same block index every grid step -> they stay resident in VMEM and act as
    accumulators (init at step 0, written back once at the end).
    """
    i = pl.program_id(0)

    @pl.when(i == 0)
    def _():
        sum_ref[...] = jnp.zeros_like(sum_ref)
        sq_ref[...] = jnp.zeros_like(sq_ref)

    x = x_ref[...].astype(jnp.float32)

    if ragged:
        # Static (trace-time) flag: only the last tile over-runs the array;
        # its out-of-range rows hold unspecified data, so zero them before
        # reducing (zeros do not perturb the sums).
        row0 = i * rows_tile
        gid = jax.lax.broadcasted_iota(jnp.int32, x.shape, 0) + row0
        x = jnp.where(gid < valid_rows, x, 0.0)

    # Column sums on the MXU (idle otherwise) instead of an XLU cross-sublane
    # reduction: ones(1, R) @ x(R, C_lane) -> (1, C_lane).
    ones = jnp.ones((1, x.shape[0]), dtype=jnp.float32)
    sum_ref[...] += jnp.dot(ones, x, preferred_element_type=jnp.float32)
    sq_ref[...] += jnp.dot(ones, x * x, preferred_element_type=jnp.float32)


def _norm_kernel(x_ref, scale_ref, shift_ref, o_ref):
    """Pass 2: y = x * scale + shift (one mul + one add per element)."""
    x = x_ref[...].astype(jnp.float32)
    o_ref[...] = (x * scale_ref[...] + shift_ref[...]).astype(o_ref.dtype)


def bn_sequential_forward(x, gamma, beta):
    """BN_Sequential forward.  x: (B, T, C) channel-last.  Returns (B, T, C)."""
    B, T, C = x.shape
    n_rows = B * T

    # ---- choose a lane-dense 2-D layout (rows, C_lane) ----------------------
    if C % _LANE == 0:
        pack = 1                      # already lane-dense
    elif C < _LANE and _LANE % C == 0 and n_rows % (_LANE // C) == 0:
        pack = _LANE // C             # pack rows into lanes (free reshape)
    else:
        pack = 1                      # full-C blocks: correct, lanes may mask
    c_lane = pack * C
    rows = n_rows // pack

    x2d = x.reshape(rows, c_lane)

    # Row-tile size: multiple of 8 sublanes, capped by the VMEM budget
    # (4 tile-sized buffers: input x2 + output x2 double-buffering).
    rows_cap = max(
        _SUBLANE,
        (_VMEM_WORKSET_BUDGET // (4 * c_lane * 4)) // _SUBLANE * _SUBLANE)
    rows_tile = min(_MAX_ROWS_TILE, rows_cap)
    if rows <= rows_tile:
        rows_tile = rows              # single tile == full array dim (legal)
    n_tiles = pl.cdiv(rows, rows_tile)
    ragged = (rows % rows_tile) != 0  # last tile partial -> mask in pass 1

    # ---- pass 1: per-channel (per-lane) sum and sum-of-squares --------------
    sum_lane, sq_lane = pl.pallas_call(
        functools.partial(_stats_kernel, rows_tile=rows_tile,
                          valid_rows=rows, ragged=ragged),
        out_shape=(jax.ShapeDtypeStruct((1, c_lane), jnp.float32),
                   jax.ShapeDtypeStruct((1, c_lane), jnp.float32)),
        grid=(n_tiles,),
        in_specs=[pl.BlockSpec((rows_tile, c_lane), lambda i: (i, 0))],
        out_specs=(pl.BlockSpec((1, c_lane), lambda i: (0, 0)),
                   pl.BlockSpec((1, c_lane), lambda i: (0, 0))),
        compiler_params=pltpu.CompilerParams(
            dimension_semantics=("arbitrary",)),   # sequential reduction axis
    )(x2d)

    # ---- fold packed lane groups & precompute per-channel scale/shift -------
    # Tiny O(C) work done once; keeps gamma/beta/mean/inv_std out of the
    # per-tile inner loop entirely.
    inv_n = 1.0 / float(n_rows)
    sum_c = sum_lane.reshape(pack, C).sum(axis=0)
    sq_c = sq_lane.reshape(pack, C).sum(axis=0)
    mean = sum_c * inv_n
    var = jnp.maximum(sq_c * inv_n - mean * mean, 0.0)   # biased variance
    inv_std = jax.lax.rsqrt(var + EPS)
    scale_c = gamma.astype(jnp.float32) * inv_std
    shift_c = beta.astype(jnp.float32) - mean * scale_c
    scale_lane = jnp.tile(scale_c, pack).reshape(1, c_lane)
    shift_lane = jnp.tile(shift_c, pack).reshape(1, c_lane)

    # ---- pass 2: normalize (row-parallel, single FMA per element) -----------
    out2d = pl.pallas_call(
        _norm_kernel,
        out_shape=jax.ShapeDtypeStruct((rows, c_lane), x.dtype),
        grid=(n_tiles,),
        in_specs=[pl.BlockSpec((rows_tile, c_lane), lambda i: (i, 0)),
                  pl.BlockSpec((1, c_lane), lambda i: (0, 0)),
                  pl.BlockSpec((1, c_lane), lambda i: (0, 0))],
        out_specs=pl.BlockSpec((rows_tile, c_lane), lambda i: (i, 0)),
        compiler_params=pltpu.CompilerParams(
            dimension_semantics=("parallel",)),    # shards across TCs on v7x
    )(x2d, scale_lane, shift_lane)

    return out2d.reshape(B, T, C)


def _reference(x, gamma, beta):
    # Pure-JAX reference of training-mode BatchNorm1d over the channel axis.
    xf = x.astype(jnp.float32)
    mean = jnp.mean(xf, axis=(0, 1), keepdims=True)
    var = jnp.mean((xf - mean) ** 2, axis=(0, 1), keepdims=True)
    y = (xf - mean) / jnp.sqrt(var + EPS)
    return (y * gamma + beta).astype(x.dtype)


if __name__ == "__main__":
    key = jax.random.PRNGKey(0)
    kx, kg, kb = jax.random.split(key, 3)

    B, T, C = 2, 8, 32  # batch, seq, features (in_dim = C)
    x = jax.random.normal(kx, (B, T, C), dtype=jnp.float32)
    # PyTorch default init is gamma=1, beta=0; perturb deterministically so the
    # affine path is exercised.
    gamma = 1.0 + 0.1 * jax.random.normal(kg, (C,), dtype=jnp.float32)
    beta = 0.1 * jax.random.normal(kb, (C,), dtype=jnp.float32)

    out = bn_sequential_forward(x, gamma, beta)
    out = jax.block_until_ready(out)

    ref = _reference(x, gamma, beta)
    assert out.shape == (B, T, C)
    assert jnp.allclose(out, ref, atol=1e-5, rtol=1e-5), "mismatch vs reference"

    print("KERNEL_OK")
</pallas_src>

<mosaic_0001>
module attributes {stable_mosaic.version = 11 : i64} {
  func.func @_stats_kernel(%arg0: i32, %arg1: memref<4x128xf32, #tpu.memory_space<vmem>>, %arg2: memref<1x128xf32, #tpu.memory_space<vmem>>, %arg3: memref<1x128xf32, #tpu.memory_space<vmem>>) attributes {dimension_semantics = [#tpu.dimension_semantics<arbitrary>], iteration_bounds = array<i64: 1>, scalar_prefetch = 0 : i64, scratch_operands = 0 : i64, tpu.core_type = #tpu.core_type<tc>, window_params = [{transform_indices = @transform_0, window_bounds = array<i64: 4, 128>}, {pipeline_mode = #tpu.pipeline_mode<synchronous>, transform_indices = @transform_1, window_bounds = array<i64: 1, 128>}, {pipeline_mode = #tpu.pipeline_mode<synchronous>, transform_indices = @transform_2, window_bounds = array<i64: 1, 128>}]} {
    %c0_i32 = arith.constant 0 : i32
    %0 = arith.cmpi eq, %arg0, %c0_i32 : i32
    %1 = arith.extui %0 : i1 to i32
    %c0_i32_0 = arith.constant 0 : i32
    %2 = arith.cmpi ne, %1, %c0_i32_0 : i32
    scf.if %2 {
      %cst_12 = arith.constant 0.000000e+00 : f32
      %14 = vector.broadcast %cst_12 : f32 to vector<1x128xf32>
      %c0_13 = arith.constant 0 : index
      %c0_14 = arith.constant 0 : index
      %15 = vector.load %arg2[%c0_13, %c0_14] : memref<1x128xf32, #tpu.memory_space<vmem>>, vector<1x128xf32>
      tpu.vector_store %arg2[%c0_13, %c0_14], %14 {strides = array<i32>} : memref<1x128xf32, #tpu.memory_space<vmem>>, vector<1x128xf32>,
      %cst_15 = arith.constant 0.000000e+00 : f32
      %16 = vector.broadcast %cst_15 : f32 to vector<1x128xf32>
      %c0_16 = arith.constant 0 : index
      %c0_17 = arith.constant 0 : index
      %17 = vector.load %arg3[%c0_16, %c0_17] : memref<1x128xf32, #tpu.memory_space<vmem>>, vector<1x128xf32>
      tpu.vector_store %arg3[%c0_16, %c0_17], %16 {strides = array<i32>} : memref<1x128xf32, #tpu.memory_space<vmem>>, vector<1x128xf32>,
    } else {
    }
    %c0 = arith.constant 0 : index
    %c0_1 = arith.constant 0 : index
    %3 = vector.load %arg1[%c0, %c0_1] : memref<4x128xf32, #tpu.memory_space<vmem>>, vector<4x128xf32>
    %cst = arith.constant 1.000000e+00 : f32
    %4 = vector.broadcast %cst : f32 to vector<1x4xf32>
    %c0_2 = arith.constant 0 : index
    %c0_3 = arith.constant 0 : index
    %5 = vector.load %arg2[%c0_2, %c0_3] : memref<1x128xf32, #tpu.memory_space<vmem>>, vector<1x128xf32>
    %cst_4 = arith.constant dense<0.000000e+00> : vector<1x128xf32>
    %6 = tpu.matmul %4, %3, %cst_4 {dimension_numbers = #tpu.dot_dimension_numbers<[1], [0], [0], [1], [0, 0, 1, 1], [], []>} : vector<1x4xf32>, vector<4x128xf32>, vector<1x128xf32> -> vector<1x128xf32>
    %7 = arith.addf %5, %6 : vector<1x128xf32>
    %c0_5 = arith.constant 0 : index
    %c0_6 = arith.constant 0 : index
    %8 = vector.load %arg2[%c0_5, %c0_6] : memref<1x128xf32, #tpu.memory_space<vmem>>, vector<1x128xf32>
    tpu.vector_store %arg2[%c0_5, %c0_6], %7 {strides = array<i32>} : memref<1x128xf32, #tpu.memory_space<vmem>>, vector<1x128xf32>,
    %c0_7 = arith.constant 0 : index
    %c0_8 = arith.constant 0 : index
    %9 = vector.load %arg3[%c0_7, %c0_8] : memref<1x128xf32, #tpu.memory_space<vmem>>, vector<1x128xf32>
    %10 = arith.mulf %3, %3 : vector<4x128xf32>
    %cst_9 = arith.constant dense<0.000000e+00> : vector<1x128xf32>
    %11 = tpu.matmul %4, %10, %cst_9 {dimension_numbers = #tpu.dot_dimension_numbers<[1], [0], [0], [1], [0, 0, 1, 1], [], []>} : vector<1x4xf32>, vector<4x128xf32>, vector<1x128xf32> -> vector<1x128xf32>
    %12 = arith.addf %9, %11 : vector<1x128xf32>
    %c0_10 = arith.constant 0 : index
    %c0_11 = arith.constant 0 : index
    %13 = vector.load %arg3[%c0_10, %c0_11] : memref<1x128xf32, #tpu.memory_space<vmem>>, vector<1x128xf32>
    tpu.vector_store %arg3[%c0_10, %c0_11], %12 {strides = array<i32>} : memref<1x128xf32, #tpu.memory_space<vmem>>, vector<1x128xf32>,
    return
  }
  func.func @transform_0(%arg0: i32) -> (i32, i32) {
    %c0_i32 = arith.constant 0 : i32
    %c0_i32_0 = arith.constant 0 : i32
    return %arg0, %c0_i32 : i32, i32
  }
  func.func @transform_1(%arg0: i32) -> (i32, i32) {
    %c0_i32 = arith.constant 0 : i32
    %c0_i32_0 = arith.constant 0 : i32
    %c0_i32_1 = arith.constant 0 : i32
    return %c0_i32, %c0_i32_0 : i32, i32
  }
  func.func @transform_2(%arg0: i32) -> (i32, i32) {
    %c0_i32 = arith.constant 0 : i32
    %c0_i32_0 = arith.constant 0 : i32
    %c0_i32_1 = arith.constant 0 : i32
    return %c0_i32, %c0_i32_0 : i32, i32
  }
}

</mosaic_0001>

<bundles_post_ra>
// kernel: tpu_custom_call.1
= control target key start
LH: loop header
LB: loop body
LE: loop exit
PB: predicated region body
PF: predicated region fallthrough
CT: control target
= control target key end

     0   :  { %8 = vsyncpa [#allocation3], 0  ;;  %s379_s0 = inlined_call_operand.hbm [shape: f32[4,128], index: 0, kind: input, shape index: {}]   ;;  %s380_s1 = inlined_call_operand.hbm [shape: f32[1,128], index: 1, kind: output, shape index: {0}]   ;;  %s381_s2 = inlined_call_operand.hbm [shape: f32[1,128], index: 2, kind: output, shape index: {1}]  }
   0x1   :  { %9 = vsyncpa [#allocation4], 0 }
   0x2   :  { %10 = vsyncpa [#allocation7], 0  ;;  %s314_s9 = smov [#allocation2]   ;;  %s242_s13 = scalar_lea.hbm %s379_s0, 64 }
   0x3   :  { %s17_s10 = sshll.u32 %s314_s9, 4  ;;  %p243_p0 = scmp.ne.s32.totalorder %s379_s0, %s242_s13  ;;  %s18_s10 = int_to_ptr.vmem [resolvable:$true] %s17_s10 }
   0x4   :  { %p246_p1 = scmp.lt.u32.totalorder %s242_s13, %s379_s0 }
   0x6   :  { %p248_p2 = pnand %p246_p1, %p243_p0 }
   0x8   :  { %251 = shalt.err (!%p248_p2)
}
   0x9   :  { %s252_s18 = scalar_lea.vmem %s18_s10, 64  ;;  %p257_p4 = scmp.lt.s32.totalorder %s18_s10, %s18_s10 }
   0xa   :  { %p253_p3 = scmp.ne.s32.totalorder %s18_s10, %s252_s18  ;;  %p258_p5 = scmp.lt.s32.totalorder %s252_s18, %s252_s18 }
   0xc   :  { %p259_p6 = por %p258_p5, %p257_p4 }
   0xe   :  { %p260_p7 = pnand %p259_p6, %p253_p3 }
  0x10   :  { %263 = shalt.err (!%p260_p7)
}
  0x11   :  { %20 = dma.hbm_to_vmem [thread:$0]  %s379_s0, 64, %s18_s10, [#allocation3]  }
  0x12   :  { %308 = dma.done.wait [#allocation3], 64  }
  0x13   :  { %309 = vsyncadd [#allocation3], 4294967232  ;;  %v315_v0 = vmov 0.0   ;;  %vm316_vm0 = vmmov 0   ;;  %vm36_vm1 = vcmask 1043456   ;;  %vm32_vm2 = vcmask 31744  }
  0x14   :  { %28 = vst [vmem:[#allocation5] sm:$0x1] %v315_v0  ;;  %29 = vst [vmem:[#allocation6] sm:$0x1] %v315_v0  ;;  %226 = vmatprep.subr.mxu0 %v315_v0  ;;  %228 = vmatprep.mubr.msk.f32.mxu0 %vm316_vm0, %v315_v0  ;;  %v30_v1 = vld [vmem:[#allocation2] sm:$0xf] }
  0x15   :  { %231 = vmatprep.subr.mxu1 %v315_v0  ;;  %233 = vmatprep.mubr.msk.f32.mxu1 %vm316_vm0, %v315_v0  ;;  %v113_v2 = vmul.f32 %v30_v1, %v30_v1  ;;  %v317_v3 = vmov 1.0   ;;  %s318_s0 = smov [#allocation5]   ;;  %s319_s22 = smov [#allocation6]  }
  0x16   :  { %227 = vmatpush3.msk.msra.mxu0 %vm36_vm1, %v30_v1  ;;  %s195_s21 = sshll.u32 %s318_s0, 4  ;;  %s205_s23 = sshll.u32 %s319_s22, 4  ;;  %s196_s21 = int_to_ptr.vmem [resolvable:$true] %s195_s21  ;;  %s347_s23 = int_to_ptr.vmem [resolvable:$true] %s205_s23 }
  0x17   :  { %229 = vmatmul.mubr.msk.f32.vlgmr.msra.gmra.mrb[0].mxu0 %vm32_vm2, %v317_v3  ;;  %232 = vmatpush3.msk.msra.mxu1 %vm36_vm1, %v113_v2  ;;  %s264_s24 = scalar_lea.vmem %s196_s21, 16  ;;  %s268_s25 = scalar_lea.vmem %s196_s21, 32 }
  0x18   :  { %234 = vmatmul.mubr.msk.f32.vlgmr.msra.gmra.mrb[0].mxu1 %vm32_vm2, %v317_v3  ;;  %p265_p8 = scmp.ne.s32.totalorder %s196_s21, %s264_s24  ;;  %p269_p9 = scmp.lt.s32.totalorder %s196_s21, %s196_s21 }
  0x19   :  { %p270_p10 = scmp.lt.s32.totalorder %s268_s25, %s264_s24 }
  0x1b   :  { %v31_v4 = vld [vmem:[#allocation5] sm:$0x1]  ;;  %v112_v6 = vld [vmem:[#allocation6] sm:$0x1]  ;;  %p271_p11 = por %p270_p10, %p269_p9 }
  0x1d   :  { %p272_p12 = pnand %p271_p11, %p265_p8 }
  0xea   :  { %v106_v5 = vpop.f32.mrb[0].mxu0 }
  0xeb   :  { %v110_v7 = vadd.f32 %v106_v5, %v31_v4  ;;  %v230_v8 = vpop.f32.mrb[1].mxu0  ;;  %v183_v9 = vpop.f32.mrb[0].mxu1 }
  0xec   :  { %v187_v10 = vadd.f32 %v183_v9, %v112_v6  ;;  %v235_v11 = vpop.f32.mrb[1].mxu1 }
  0xed   :  { %111 = vst [vmem:[#allocation5] sm:$0x1] %v110_v7 }
  0xee   :  { %275 = shalt.err (!%p272_p12)
}
  0xef   :  { %s276_s28 = scalar_lea.hbm %s380_s1, 16 }
  0xf0   :  { %p277_p13 = scmp.ne.s32.totalorder %s380_s1, %s276_s28  ;;  %p280_p0 = scmp.lt.u32.totalorder %s276_s28, %s380_s1 }
  0xf2   :  { %p282_p1 = pnand %p280_p0, %p277_p13 }
  0xf4   :  { %285 = shalt.err (!%p282_p1)
}
  0xf5   :  { %198 = dma.vmem_to_hbm [thread:$0]  %s196_s21, 16, %s380_s1, [#allocation4]   ;;  %188 = vst [vmem:[#allocation6] sm:$0x1] %v187_v10 }
  0xf6   :  { %s286_s7 = scalar_lea.vmem %s347_s23, 16  ;;  %s290_s8 = scalar_lea.vmem %s347_s23, 32 }
  0xf7   :  { %p287_p2 = scmp.ne.s32.totalorder %s347_s23, %s286_s7  ;;  %p291_p3 = scmp.lt.s32.totalorder %s347_s23, %s347_s23 }
  0xf8   :  { %p292_p4 = scmp.lt.s32.totalorder %s290_s8, %s286_s7 }
  0xfa   :  { %p293_p5 = por %p292_p4, %p291_p3 }
  0xfc   :  { %p294_p6 = pnand %p293_p5, %p287_p2 }
  0xfe   :  { %297 = shalt.err (!%p294_p6)
}
  0xff   :  { %s298_s11 = scalar_lea.hbm %s381_s2, 16 }
 0x100   :  { %p299_p7 = scmp.ne.s32.totalorder %s381_s2, %s298_s11  ;;  %p302_p8 = scmp.lt.u32.totalorder %s298_s11, %s381_s2 }
 0x102   :  { %p304_p9 = pnand %p302_p8, %p299_p7 }
 0x104   :  { %307 = shalt.err (!%p304_p9)
}
 0x105   :  { %208 = dma.vmem_to_hbm [thread:$0]  %s347_s23, 16, %s381_s2, [#allocation7]  }
 0x106   :  { %310 = dma.done.wait [#allocation4], 16  }
 0x107   :  { %311 = vsyncadd [#allocation4], 4294967280 }
 0x108   :  { %312 = dma.done.wait [#allocation7], 16  }
 0x109   :  { %313 = vsyncadd [#allocation7], 4294967280 }
 0x10a   :  { %215 = vsyncpa [#allocation3], 1 }
 0x10b   :  { %216 = vsyncpa [#allocation4], 1 }
 0x10c   :  { %217 = vsyncpa [#allocation7], 1 }

</bundles_post_ra>
